<compile_context>
chip_gen: v6e
topology: v6e:2x2x1
jax: 0.10.0
libtpu: 0.0.40
codegen_flags: <defaults>
</compile_context>

<pallas_src>
import math
import functools

import jax
import jax.numpy as jnp
from jax.experimental import pallas as pl
from jax.experimental.pallas import tpu as pltpu


# ----------------------------------------------------------------------------
# Buffer construction — reproduces the double loop in the PyTorch __init__
# ----------------------------------------------------------------------------
def build_pe(max_seq_len: int, len_word: int) -> jnp.ndarray:
    pos = jnp.arange(max_seq_len, dtype=jnp.float32)[:, None]           # (S, 1)
    i_even = jnp.arange(0, len_word, 2, dtype=jnp.float32)[None, :]     # (1, ceil(L/2))

    # pe[pos, i]     = sin(pos / 10000 ** (2 * i       / lenWord))
    # pe[pos, i + 1] = cos(pos / 10000 ** (2 * (i + 1) / lenWord))
    sin_part = jnp.sin(pos / jnp.power(10000.0, 2.0 * i_even / len_word))

    pe = jnp.zeros((max_seq_len, len_word), dtype=jnp.float32)
    pe = pe.at[:, 0::2].set(sin_part)

    n_odd = len_word // 2  # number of odd columns actually present
    if len_word != 1 and n_odd > 0:
        i_for_cos = i_even[:, :n_odd]
        cos_part = jnp.cos(pos / jnp.power(10000.0, 2.0 * (i_for_cos + 1.0) / len_word))
        pe = pe.at[:, 1::2].set(cos_part)
    return pe[None, :, :]  # (1, max_seq_len, lenWord)


# ----------------------------------------------------------------------------
# Pallas kernel: elementwise scale + broadcast-add of the (flattened) PE row
# ----------------------------------------------------------------------------
def pe_add_kernel(x_ref, pe_ref, o_ref, *, scale: float):
    # x_ref: (row_tile, S*L)   pe_ref: (1, S*L)   o_ref: (row_tile, S*L)
    o_ref[...] = (x_ref[...] * scale + pe_ref[...]).astype(o_ref.dtype)


def positional_encoder_fixed(x: jnp.ndarray, pe: jnp.ndarray,
                             len_word: int) -> jnp.ndarray:
    """x * sqrt(lenWord) + pe[:, :seq_len]; dropout(p=0.0) is an identity."""
    B, S, L = x.shape
    assert L == len_word

    # Slice + cast PE once in the wrapper (single HBM read in x's dtype).
    pe_slice = pe[:, :S, :].astype(x.dtype)          # (1, S, L)

    # Lane-dense 2D layout: last axis = S*L (wide, unmasked stores when >=128).
    cols = S * L
    x2 = x.reshape(B, cols)
    pe2 = pe_slice.reshape(1, cols)

    # Row tile: largest multiple of 8 rows that keeps the double-buffered
    # x/out tiles under a conservative per-buffer budget (fits v7x's smaller
    # VMEM; v5e/v6e have more headroom, same tile still hits their roofline).
    itemsize = jnp.dtype(x.dtype).itemsize
    vmem_budget_per_buf = 8 * 1024 * 1024            # bytes per (double-buffered) tile
    rows_by_vmem = max(8, vmem_budget_per_buf // max(1, cols * itemsize))
    row_tile = min(1024, (rows_by_vmem // 8) * 8)
    if B <= row_tile:
        row_tile = B                                 # single full-dim block (always legal)
    grid = (pl.cdiv(B, row_tile),)

    kernel = functools.partial(pe_add_kernel, scale=math.sqrt(len_word))

    out2 = pl.pallas_call(
        kernel,
        out_shape=jax.ShapeDtypeStruct((B, cols), x.dtype),
        grid=grid,
        in_specs=[
            pl.BlockSpec((row_tile, cols), lambda r: (r, 0)),  # x: one row-tile per step
            pl.BlockSpec((1, cols), lambda r: (0, 0)),         # pe: constant block -> stays resident
        ],
        out_specs=pl.BlockSpec((row_tile, cols), lambda r: (r, 0)),
        compiler_params=pltpu.CompilerParams(
            dimension_semantics=("parallel",)),                # shards row tiles across v7x's 2 TCs
    )(x2, pe2)

    # TODO(synk): dropout with p > 0 would need pltpu.prng_seed /
    # prng_random_bits; the module default p = 0.0 makes it an identity.
    return out2.reshape(B, S, L)


# ----------------------------------------------------------------------------
# Demo / self-check
# ----------------------------------------------------------------------------
if __name__ == "__main__":
    LEN_WORD = 32
    MAX_SEQ_LEN = 200
    B, S = 2, 8

    key = jax.random.PRNGKey(0)
    x = jax.random.normal(key, (B, S, LEN_WORD), dtype=jnp.float32)

    pe = build_pe(MAX_SEQ_LEN, LEN_WORD)

    out = positional_encoder_fixed(x, pe, LEN_WORD)
    out = jax.block_until_ready(out)

    # Reference check (plain JAX)
    ref = x * math.sqrt(LEN_WORD) + pe[:, :S, :]
    assert out.shape == (B, S, LEN_WORD)
    assert jnp.allclose(out, ref, atol=1e-5, rtol=1e-5)

    print("KERNEL_OK")
</pallas_src>

<mosaic_0001>
module attributes {stable_mosaic.version = 11 : i64} {
  func.func @pe_add_kernel(%arg0: i32, %arg1: memref<2x256xf32, #tpu.memory_space<vmem>>, %arg2: memref<1x256xf32, #tpu.memory_space<vmem>>, %arg3: memref<2x256xf32, #tpu.memory_space<vmem>>) attributes {dimension_semantics = [#tpu.dimension_semantics<parallel>], iteration_bounds = array<i64: 1>, scalar_prefetch = 0 : i64, scratch_operands = 0 : i64, tpu.core_type = #tpu.core_type<tc>, window_params = [{transform_indices = @transform_0, window_bounds = array<i64: 2, 256>}, {pipeline_mode = #tpu.pipeline_mode<synchronous>, transform_indices = @transform_1, window_bounds = array<i64: 1, 256>}, {transform_indices = @transform_2, window_bounds = array<i64: 2, 256>}]} {
    %c0 = arith.constant 0 : index
    %c0_0 = arith.constant 0 : index
    %0 = vector.load %arg1[%c0, %c0_0] : memref<2x256xf32, #tpu.memory_space<vmem>>, vector<2x256xf32>
    %cst = arith.constant 5.65685415 : f32
    %1 = vector.broadcast %cst : f32 to vector<2x256xf32>
    %2 = arith.mulf %0, %1 : vector<2x256xf32>
    %c0_1 = arith.constant 0 : index
    %c0_2 = arith.constant 0 : index
    %3 = vector.load %arg2[%c0_1, %c0_2] : memref<1x256xf32, #tpu.memory_space<vmem>>, vector<1x256xf32>
    %4 = vector.broadcast %3 : vector<1x256xf32> to vector<2x256xf32>
    %5 = arith.addf %2, %4 : vector<2x256xf32>
    %c0_3 = arith.constant 0 : index
    %c0_4 = arith.constant 0 : index
    %6 = vector.load %arg3[%c0_3, %c0_4] : memref<2x256xf32, #tpu.memory_space<vmem>>, vector<2x256xf32>
    tpu.vector_store %arg3[%c0_3, %c0_4], %5 {strides = array<i32>} : memref<2x256xf32, #tpu.memory_space<vmem>>, vector<2x256xf32>,
    return
  }
  func.func @transform_0(%arg0: i32) -> (i32, i32) {
    %c0_i32 = arith.constant 0 : i32
    %c0_i32_0 = arith.constant 0 : i32
    return %arg0, %c0_i32 : i32, i32
  }
  func.func @transform_1(%arg0: i32) -> (i32, i32) {
    %c0_i32 = arith.constant 0 : i32
    %c0_i32_0 = arith.constant 0 : i32
    %c0_i32_1 = arith.constant 0 : i32
    return %c0_i32, %c0_i32_0 : i32, i32
  }
  func.func @transform_2(%arg0: i32) -> (i32, i32) {
    %c0_i32 = arith.constant 0 : i32
    %c0_i32_0 = arith.constant 0 : i32
    return %arg0, %c0_i32 : i32, i32
  }
}

</mosaic_0001>

<bundles_post_ra>
// kernel: tpu_custom_call.1
= control target key start
LH: loop header
LB: loop body
LE: loop exit
PB: predicated region body
PF: predicated region fallthrough
CT: control target
= control target key end

     0   :  { %7 = vsyncpa [#allocation3], 0  ;;  %s173_s0 = inlined_call_operand.hbm [shape: f32[2,256], index: 0, kind: input, shape index: {}]   ;;  %s174_s1 = inlined_call_operand.hbm [shape: f32[1,256], index: 1, kind: input, shape index: {}]   ;;  %s175_s2 = inlined_call_operand.hbm [shape: f32[2,256], index: 2, kind: output, shape index: {}]  }
   0x1   :  { %8 = vsyncpa [#allocation6], 0 }
   0x2   :  { %9 = vsyncpa [#allocation4], 0  ;;  %s145_s9 = smov [#allocation2]   ;;  %s146_s11 = smov [#allocation5]  }
   0x3   :  { %s16_s10 = sshll.u32 %s145_s9, 4  ;;  %s26_s12 = sshll.u32 %s146_s11, 4  ;;  %s17_s10 = int_to_ptr.vmem [resolvable:$true] %s16_s10  ;;  %s27_s12 = int_to_ptr.vmem [resolvable:$true] %s26_s12 }
   0x4   :  { %s87_s13 = scalar_lea.vmem %s17_s10, 64  ;;  %p92_p1 = scmp.lt.s32.totalorder %s17_s10, %s17_s10 }
   0x5   :  { %p88_p0 = scmp.ne.s32.totalorder %s17_s10, %s87_s13  ;;  %p93_p2 = scmp.lt.s32.totalorder %s87_s13, %s87_s13 }
   0x7   :  { %p94_p3 = por %p93_p2, %p92_p1 }
   0x9   :  { %p95_p4 = pnand %p94_p3, %p88_p0 }
   0xb   :  { %98 = shalt.err (!%p95_p4)
}
   0xc   :  { %19 = dma.hbm_to_vmem [thread:$0]  %s173_s0, 64, %s17_s10, [#allocation3]  }
   0xd   :  { %s107_s16 = scalar_lea.vmem %s27_s12, 32  ;;  %p112_p6 = scmp.lt.s32.totalorder %s27_s12, %s27_s12 }
   0xe   :  { %p108_p5 = scmp.ne.s32.totalorder %s27_s12, %s107_s16  ;;  %p113_p7 = scmp.lt.s32.totalorder %s107_s16, %s107_s16 }
  0x10   :  { %p114_p8 = por %p113_p7, %p112_p6 }
  0x12   :  { %p115_p9 = pnand %p114_p8, %p108_p5 }
  0x14   :  { %118 = shalt.err (!%p115_p9)
}
  0x15   :  { %29 = dma.hbm_to_vmem [thread:$0]  %s174_s1, 32, %s27_s12, [#allocation6]  }
  0x16   :  { %139 = dma.done.wait [#allocation3], 64  }
  0x17   :  { %140 = vsyncadd [#allocation3], 4294967232 }
  0x18   :  { %141 = dma.done.wait [#allocation6], 32  }
  0x19   :  { %142 = vsyncadd [#allocation6], 4294967264  ;;  %v40_v0 = vlaneseq  ;;  %v147_v1 = vmov 1983009808   ;;  %v36_v7 = vld [vmem:[#allocation2] sm:$0xf] }
  0x1a   :  { %v50_v2 = vunpack.c.l.s4 %v147_v1  ;;  %v38_v8 = vld [vmem:[#allocation5] sm:$0x3]  ;;  %v37_v12 = vmul.f32 5.656854, %v36_v7  ;;  %s148_s0 = smov [#allocation7]  }
  0x1b   :  { %v41_v3 = vshrl.u32 %v40_v0, 7  ;;  %s65_s1 = sshll.u32 %s148_s0, 4  ;;  %s66_s1 = int_to_ptr.vmem [resolvable:$true] %s65_s1 }
  0x1c   :  { %v51_v6 = vunpack.c.0.s8 %v50_v2  ;;  %s119_s19 = scalar_lea.vmem %s66_s1, 64  ;;  %p124_p11 = scmp.lt.s32.totalorder %s66_s1, %s66_s1 }
  0x1d   :  { %v42_v4 = vsub.s32 0, %v41_v3  ;;  %v46_v5 = vsub.s32 1, %v41_v3  ;;  %p120_p10 = scmp.ne.s32.totalorder %s66_s1, %s119_s19  ;;  %p125_p12 = scmp.lt.s32.totalorder %s119_s19, %s119_s19 }
  0x1e   :  { %v54_v11 = vsub.s32 %v51_v6, %v41_v3 }
  0x1f   :  { %v43_v9 = vrot.slane %v38_v8, %v42_v4  ;;  %v47_v10 = vrot.slane %v38_v8, %v46_v5  ;;  %p126_p13 = por %p125_p12, %p124_p11 }
  0x21   :  { %v48_v13 = vcombine.low %v43_v9, %v47_v10  ;;  %p127_p0 = pnand %p126_p13, %p120_p10 }
  0x23   :  { %v55_v14 = vrot.slane %v48_v13, %v54_v11 }
  0x25   :  { %v57_v15 = vadd.f32 %v55_v14, %v37_v12 }
  0x27   :  { %58 = vst [vmem:[#allocation7] sm:$0xf] %v57_v15 }
  0x28   :  { %130 = shalt.err (!%p127_p0)
}
  0x29   :  { %68 = dma.vmem_to_hbm [thread:$0]  %s66_s1, 64, %s175_s2, [#allocation4]  }
  0x2a   :  { %143 = dma.done.wait [#allocation4], 64  }
  0x2b   :  { %144 = vsyncadd [#allocation4], 4294967232 }
  0x2c   :  { %72 = vsyncpa [#allocation3], 1 }
  0x2d   :  { %73 = vsyncpa [#allocation6], 1 }
  0x2e   :  { %74 = vsyncpa [#allocation4], 1 }

</bundles_post_ra>
